<compile_context>
chip_gen: v7x
topology: tpu7x:2x2x1
jax: 0.10.0
libtpu: 0.0.40
codegen_flags: <defaults>
</compile_context>

<pallas_src>
import functools

import jax
import jax.numpy as jnp
from jax.experimental import pallas as pl
from jax.experimental.pallas import tpu as pltpu

_LANE = 128


def _round_up(n, m):
    return ((n + m - 1) // m) * m


def _default_compute_dtype():
    # bf16 packs 2x elements per vreg and v6e/v7x have bf16 VALU/EUP -> ~2x
    # fewer vector ops and half the HBM bytes.  v5e and older have no bf16
    # VPU/EUP, so stay in f32 there.
    try:
        kind = jax.devices()[0].device_kind.lower()
    except Exception:  # pragma: no cover - defensive only
        return jnp.dtype(jnp.float32)
    if "v6" in kind or "v7" in kind:
        return jnp.dtype(jnp.bfloat16)
    return jnp.dtype(jnp.float32)


def _choose_tiling(batch, tb):
    """Pick (tile, n_tiles, padded_batch) with batch on the 128-lane axis."""
    b128 = _round_up(max(int(batch), 1), _LANE)
    tb = _round_up(max(int(tb), _LANE), _LANE)
    n_tiles = -(-b128 // tb)
    # v7x has two TensorCores sharing the "parallel" grid axis: make sure a
    # reasonably large batch produces at least two tiles.
    if n_tiles == 1 and b128 >= 16 * _LANE:
        n_tiles = 2
    tile = _round_up(-(-b128 // n_tiles), _LANE)
    return tile, n_tiles, tile * n_tiles


def _vmem_limit_bytes(tile, itemsize):
    # Double-buffered io blocks ((8+4+8) rows x2) plus ~44 rows of live
    # intermediates / compiler headroom per batch element.
    need = tile * itemsize * (2 * (8 + 4 + 8) + 44)
    # Clamp to 48 MiB: safe within v7x's 64 MiB physical VMEM.  v5e/v6e have
    # 128 MiB if you want to push `tb` beyond ~128k rows.
    return int(min(max(need, 32 * 2**20), 48 * 2**20))


def _affine_tanh(x, w, b):
    """tanh(w @ x + b) with the batch on the lane axis.

    x: (in_dim, TB)      activations
    w: (out_dim, in_dim) pre-scaled weights
    b: (out_dim, 1)      pre-folded bias (lane-broadcast)

    Unrolled VPU broadcast-FMA over the tiny contraction dim (no MXU).  Two
    interleaved accumulators break the serial mul->add dependency chain so the
    four VALU slots stay fed.
    """
    in_dim = w.shape[1]
    assert in_dim % 2 == 0
    acc0 = w[:, 0:1] * x[0:1, :]
    acc1 = w[:, 1:2] * x[1:2, :]
    for k in range(2, in_dim, 2):
        acc0 = acc0 + w[:, k:k + 1] * x[k:k + 1, :]
        acc1 = acc1 + w[:, k + 1:k + 2] * x[k + 1:k + 2, :]
    return jnp.tanh(acc0 + (acc1 + b))


def autoencoder_kernel(x_ref,
                       w1_ref, b1_ref, w2_ref, b2_ref,
                       w3_ref, b3_ref, w4_ref, b4_ref,
                       enc_ref, dec_ref):
    x = x_ref[...]                                            # (8,  TB)
    # Sigmoid affine constants are folded into the weights (see _fold_params),
    # so hidden activations stay in tanh-domain.
    h1_t = _affine_tanh(x, w1_ref[...], b1_ref[...])          # (16, TB)
    enc_t = _affine_tanh(h1_t, w2_ref[...], b2_ref[...])      # (4,  TB)
    enc = 0.5 * enc_t + 0.5                                   # explicit: it is an output
    enc_ref[...] = enc.astype(enc_ref.dtype)
    h3_t = _affine_tanh(enc, w3_ref[...], b3_ref[...])        # (16, TB)
    dec_t = _affine_tanh(h3_t, w4_ref[...], b4_ref[...])      # (8,  TB)
    dec_ref[...] = (0.5 * dec_t + 0.5).astype(dec_ref.dtype)


def _fold_params(params, dtype):
    """Fold sigmoid(z)=0.5*tanh(0.5*z)+0.5 constants into the weights.

      layer1: t1 = tanh(0.5*W1 x   + 0.5*b1)                    (h1 = 0.5*t1+0.5, never built)
      layer2: t2 = tanh(0.25*W2 t1 + 0.5*b2 + 0.25*W2@1)        (enc = 0.5*t2+0.5)
      layer3: t3 = tanh(0.5*W3 enc + 0.5*b3)
      layer4: t4 = tanh(0.25*W4 t3 + 0.5*b4 + 0.25*W4@1)        (dec = 0.5*t4+0.5)
    """
    w1, b1 = params["w1"], params["b1"]
    w2, b2 = params["w2"], params["b2"]
    w3, b3 = params["w3"], params["b3"]
    w4, b4 = params["w4"], params["b4"]
    folded = (
        0.5 * w1, 0.5 * b1,
        0.25 * w2, 0.5 * b2 + 0.25 * jnp.sum(w2, axis=1, keepdims=True),
        0.5 * w3, 0.5 * b3,
        0.25 * w4, 0.5 * b4 + 0.25 * jnp.sum(w4, axis=1, keepdims=True),
    )
    return tuple(a.astype(dtype) for a in folded)


def _autoencoder_pallas(x_t, fparams, tile, n_tiles, cdt):
    """x_t: (8, B_pad) in compute dtype, B_pad = tile * n_tiles."""
    b_pad = x_t.shape[1]

    def act_spec(rows):
        # Activations tiled along the batch/lane axis (lane-dense stores).
        return pl.BlockSpec((rows, tile), lambda i: (0, i))

    def const_spec(a):
        # Tiny weights/biases: same block every step -> stay VMEM-resident.
        return pl.BlockSpec(a.shape, lambda i: (0, 0))

    in_specs = [act_spec(8)] + [const_spec(a) for a in fparams]
    out_specs = (act_spec(4), act_spec(8))
    out_shape = (
        jax.ShapeDtypeStruct((4, b_pad), cdt),   # encoded^T
        jax.ShapeDtypeStruct((8, b_pad), cdt),   # decoded^T
    )

    itemsize = jnp.dtype(cdt).itemsize
    param_bytes = int(sum(a.size * a.dtype.itemsize for a in fparams))
    cost = pl.CostEstimate(
        flops=2 * (8 * 16 + 16 * 4 + 4 * 16 + 16 * 8) * b_pad,
        transcendentals=(16 + 4 + 16 + 8) * b_pad,
        bytes_accessed=itemsize * (8 + 4 + 8) * b_pad + param_bytes,
    )

    return pl.pallas_call(
        autoencoder_kernel,
        grid=(n_tiles,),
        in_specs=in_specs,
        out_specs=out_specs,
        out_shape=out_shape,
        compiler_params=pltpu.CompilerParams(
            dimension_semantics=("parallel",),
            vmem_limit_bytes=_vmem_limit_bytes(tile, itemsize),
        ),
        cost_estimate=cost,
    )(x_t, *fparams)


@functools.partial(jax.jit, static_argnames=("tb", "compute_dtype"))
def autoencoder_forward_t(x_t, params, *, tb=65536, compute_dtype=None):
    """Feature-major forward: x_t (8, B) -> (encoded^T (4, B), decoded^T (8, B)).

    Keeping activations feature-major (batch on lanes) end-to-end avoids the
    row-major transpose/pad copy passes that otherwise ~3x off-kernel HBM
    traffic.  Outputs are in the compute dtype (bf16 on v6e/v7x by default).
    """
    cdt = jnp.dtype(compute_dtype) if compute_dtype is not None else _default_compute_dtype()
    batch = x_t.shape[1]
    tile, n_tiles, b_pad = _choose_tiling(batch, tb)

    xp = x_t.astype(cdt)
    if b_pad != batch:
        xp = jnp.pad(xp, ((0, 0), (0, b_pad - batch)))

    fparams = _fold_params(params, cdt)
    enc_t, dec_t = _autoencoder_pallas(xp, fparams, tile, n_tiles, cdt)

    if b_pad != batch:
        enc_t, dec_t = enc_t[:, :batch], dec_t[:, :batch]
    return enc_t, dec_t


@functools.partial(jax.jit, static_argnames=("tb", "compute_dtype"))
def autoencoder_forward(x, params, *, tb=65536, compute_dtype=None):
    """Row-major convenience wrapper matching the PyTorch module.

    x: (B, 8) -> (encoded (B, 4), decoded (B, 8)) in float32.  The transposes
    here are extra XLA copy passes; prefer `autoencoder_forward_t` when the
    caller can stay feature-major.
    """
    enc_t, dec_t = autoencoder_forward_t(x.T, params, tb=tb, compute_dtype=compute_dtype)
    return enc_t.T.astype(jnp.float32), dec_t.T.astype(jnp.float32)


def init_params(key):
    """Deterministic init mimicking nn.Linear's U(-1/sqrt(in), 1/sqrt(in)).

    Weights stored as (out_features, in_features) (PyTorch layout);
    biases stored as (out_features, 1) for lane-broadcast inside the kernel.
    """
    dims = [(8, 16), (16, 4), (4, 16), (16, 8)]   # (in, out) per layer
    params = {}
    keys = jax.random.split(key, 2 * len(dims))
    for i, (fin, fout) in enumerate(dims):
        bound = 1.0 / jnp.sqrt(jnp.float32(fin))
        w = jax.random.uniform(keys[2 * i], (fout, fin),
                               minval=-bound, maxval=bound, dtype=jnp.float32)
        b = jax.random.uniform(keys[2 * i + 1], (fout, 1),
                               minval=-bound, maxval=bound, dtype=jnp.float32)
        params[f"w{i + 1}"] = w
        params[f"b{i + 1}"] = b
    return params


def reference_forward(x, params):
    """Pure-JAX reference with identical semantics to the PyTorch module."""
    h = jax.nn.sigmoid(x @ params["w1"].T + params["b1"].T)
    enc = jax.nn.sigmoid(h @ params["w2"].T + params["b2"].T)
    h = jax.nn.sigmoid(enc @ params["w3"].T + params["b3"].T)
    dec = jax.nn.sigmoid(h @ params["w4"].T + params["b4"].T)
    return enc, dec


if __name__ == "__main__":
    key = jax.random.PRNGKey(0)
    pkey, xkey = jax.random.split(key)

    params = init_params(pkey)
    batch = 8
    x = jax.random.normal(xkey, (batch, 8), dtype=jnp.float32)
    enc_ref, dec_ref = reference_forward(x, params)

    # 1) f32 compute: strict check against the reference.
    enc, dec = autoencoder_forward(x, params, compute_dtype=jnp.float32)
    enc, dec = jax.block_until_ready((enc, dec))
    assert enc.shape == (batch, 4) and dec.shape == (batch, 8)
    assert jnp.allclose(enc, enc_ref, atol=5e-5, rtol=5e-5), \
        float(jnp.max(jnp.abs(enc - enc_ref)))
    assert jnp.allclose(dec, dec_ref, atol=5e-5, rtol=5e-5), \
        float(jnp.max(jnp.abs(dec - dec_ref)))

    # 2) Default (auto) compute dtype: bf16 on v6e/v7x, f32 elsewhere.
    enc2, dec2 = autoencoder_forward(x, params)
    enc2, dec2 = jax.block_until_ready((enc2, dec2))
    assert jnp.allclose(enc2.astype(jnp.float32), enc_ref, atol=5e-2)
    assert jnp.allclose(dec2.astype(jnp.float32), dec_ref, atol=5e-2)

    # 3) Feature-major (transpose-free) entry point.
    enc_t, dec_t = autoencoder_forward_t(x.T, params, compute_dtype=jnp.float32)
    enc_t, dec_t = jax.block_until_ready((enc_t, dec_t))
    assert jnp.allclose(enc_t.T, enc_ref, atol=5e-5, rtol=5e-5)
    assert jnp.allclose(dec_t.T, dec_ref, atol=5e-5, rtol=5e-5)

    # 4) Multi-tile grid + ragged batch (exercises the adaptive tiling path).
    xb = jax.random.normal(jax.random.PRNGKey(1), (300, 8), dtype=jnp.float32)
    encb, decb = autoencoder_forward(xb, params, tb=128, compute_dtype=jnp.float32)
    encb, decb = jax.block_until_ready((encb, decb))
    encb_ref, decb_ref = reference_forward(xb, params)
    assert encb.shape == (300, 4) and decb.shape == (300, 8)
    assert jnp.allclose(encb, encb_ref, atol=5e-5, rtol=5e-5)
    assert jnp.allclose(decb, decb_ref, atol=5e-5, rtol=5e-5)

    print("KERNEL_OK")
</pallas_src>

<mosaic_0001>
module attributes {stable_mosaic.version = 11 : i64} {
  func.func @autoencoder_kernel(%arg0: i32, %arg1: memref<8x128xf32, #tpu.memory_space<vmem>>, %arg2: memref<16x8xf32, #tpu.memory_space<vmem>>, %arg3: memref<16x1xf32, #tpu.memory_space<vmem>>, %arg4: memref<4x16xf32, #tpu.memory_space<vmem>>, %arg5: memref<4x1xf32, #tpu.memory_space<vmem>>, %arg6: memref<16x4xf32, #tpu.memory_space<vmem>>, %arg7: memref<16x1xf32, #tpu.memory_space<vmem>>, %arg8: memref<8x16xf32, #tpu.memory_space<vmem>>, %arg9: memref<8x1xf32, #tpu.memory_space<vmem>>, %arg10: memref<4x128xf32, #tpu.memory_space<vmem>>, %arg11: memref<8x128xf32, #tpu.memory_space<vmem>>) attributes {dimension_semantics = [#tpu.dimension_semantics<parallel>], iteration_bounds = array<i64: 1>, scalar_prefetch = 0 : i64, scratch_operands = 0 : i64, tpu.core_type = #tpu.core_type<tc>, window_params = [{transform_indices = @transform_0, window_bounds = array<i64: 8, 128>}, {pipeline_mode = #tpu.pipeline_mode<synchronous>, transform_indices = @transform_1, window_bounds = array<i64: 16, 8>}, {pipeline_mode = #tpu.pipeline_mode<synchronous>, transform_indices = @transform_2, window_bounds = array<i64: 16, 1>}, {pipeline_mode = #tpu.pipeline_mode<synchronous>, transform_indices = @transform_3, window_bounds = array<i64: 4, 16>}, {pipeline_mode = #tpu.pipeline_mode<synchronous>, transform_indices = @transform_4, window_bounds = array<i64: 4, 1>}, {pipeline_mode = #tpu.pipeline_mode<synchronous>, transform_indices = @transform_5, window_bounds = array<i64: 16, 4>}, {pipeline_mode = #tpu.pipeline_mode<synchronous>, transform_indices = @transform_6, window_bounds = array<i64: 16, 1>}, {pipeline_mode = #tpu.pipeline_mode<synchronous>, transform_indices = @transform_7, window_bounds = array<i64: 8, 16>}, {pipeline_mode = #tpu.pipeline_mode<synchronous>, transform_indices = @transform_8, window_bounds = array<i64: 8, 1>}, {transform_indices = @transform_9, window_bounds = array<i64: 4, 128>}, {transform_indices = @transform_10, window_bounds = array<i64: 8, 128>}]} {
    %c0 = arith.constant 0 : index
    %c0_0 = arith.constant 0 : index
    %0 = vector.load %arg1[%c0, %c0_0] : memref<8x128xf32, #tpu.memory_space<vmem>>, vector<8x128xf32>
    %c0_1 = arith.constant 0 : index
    %c0_2 = arith.constant 0 : index
    %1 = vector.load %arg2[%c0_1, %c0_2] : memref<16x8xf32, #tpu.memory_space<vmem>>, vector<16x8xf32>
    %c0_3 = arith.constant 0 : index
    %c0_4 = arith.constant 0 : index
    %2 = vector.load %arg3[%c0_3, %c0_4] : memref<16x1xf32, #tpu.memory_space<vmem>>, vector<16x1xf32>
    %3 = vector.extract_strided_slice %1 {offsets = [0, 0], sizes = [16, 1], strides = [1, 1]} : vector<16x8xf32> to vector<16x1xf32>
    %4 = vector.extract_strided_slice %0 {offsets = [0, 0], sizes = [1, 128], strides = [1, 1]} : vector<8x128xf32> to vector<1x128xf32>
    %5 = vector.broadcast %3 : vector<16x1xf32> to vector<16x128xf32>
    %6 = vector.broadcast %4 : vector<1x128xf32> to vector<16x128xf32>
    %7 = arith.mulf %5, %6 : vector<16x128xf32>
    %8 = vector.extract_strided_slice %1 {offsets = [0, 1], sizes = [16, 1], strides = [1, 1]} : vector<16x8xf32> to vector<16x1xf32>
    %9 = vector.extract_strided_slice %0 {offsets = [1, 0], sizes = [1, 128], strides = [1, 1]} : vector<8x128xf32> to vector<1x128xf32>
    %10 = vector.broadcast %8 : vector<16x1xf32> to vector<16x128xf32>
    %11 = vector.broadcast %9 : vector<1x128xf32> to vector<16x128xf32>
    %12 = arith.mulf %10, %11 : vector<16x128xf32>
    %13 = vector.extract_strided_slice %1 {offsets = [0, 2], sizes = [16, 1], strides = [1, 1]} : vector<16x8xf32> to vector<16x1xf32>
    %14 = vector.extract_strided_slice %0 {offsets = [2, 0], sizes = [1, 128], strides = [1, 1]} : vector<8x128xf32> to vector<1x128xf32>
    %15 = vector.broadcast %13 : vector<16x1xf32> to vector<16x128xf32>
    %16 = vector.broadcast %14 : vector<1x128xf32> to vector<16x128xf32>
    %17 = arith.mulf %15, %16 : vector<16x128xf32>
    %18 = arith.addf %7, %17 : vector<16x128xf32>
    %19 = vector.extract_strided_slice %1 {offsets = [0, 3], sizes = [16, 1], strides = [1, 1]} : vector<16x8xf32> to vector<16x1xf32>
    %20 = vector.extract_strided_slice %0 {offsets = [3, 0], sizes = [1, 128], strides = [1, 1]} : vector<8x128xf32> to vector<1x128xf32>
    %21 = vector.broadcast %19 : vector<16x1xf32> to vector<16x128xf32>
    %22 = vector.broadcast %20 : vector<1x128xf32> to vector<16x128xf32>
    %23 = arith.mulf %21, %22 : vector<16x128xf32>
    %24 = arith.addf %12, %23 : vector<16x128xf32>
    %25 = vector.extract_strided_slice %1 {offsets = [0, 4], sizes = [16, 1], strides = [1, 1]} : vector<16x8xf32> to vector<16x1xf32>
    %26 = vector.extract_strided_slice %0 {offsets = [4, 0], sizes = [1, 128], strides = [1, 1]} : vector<8x128xf32> to vector<1x128xf32>
    %27 = vector.broadcast %25 : vector<16x1xf32> to vector<16x128xf32>
    %28 = vector.broadcast %26 : vector<1x128xf32> to vector<16x128xf32>
    %29 = arith.mulf %27, %28 : vector<16x128xf32>
    %30 = arith.addf %18, %29 : vector<16x128xf32>
    %31 = vector.extract_strided_slice %1 {offsets = [0, 5], sizes = [16, 1], strides = [1, 1]} : vector<16x8xf32> to vector<16x1xf32>
    %32 = vector.extract_strided_slice %0 {offsets = [5, 0], sizes = [1, 128], strides = [1, 1]} : vector<8x128xf32> to vector<1x128xf32>
    %33 = vector.broadcast %31 : vector<16x1xf32> to vector<16x128xf32>
    %34 = vector.broadcast %32 : vector<1x128xf32> to vector<16x128xf32>
    %35 = arith.mulf %33, %34 : vector<16x128xf32>
    %36 = arith.addf %24, %35 : vector<16x128xf32>
    %37 = vector.extract_strided_slice %1 {offsets = [0, 6], sizes = [16, 1], strides = [1, 1]} : vector<16x8xf32> to vector<16x1xf32>
    %38 = vector.extract_strided_slice %0 {offsets = [6, 0], sizes = [1, 128], strides = [1, 1]} : vector<8x128xf32> to vector<1x128xf32>
    %39 = vector.broadcast %37 : vector<16x1xf32> to vector<16x128xf32>
    %40 = vector.broadcast %38 : vector<1x128xf32> to vector<16x128xf32>
    %41 = arith.mulf %39, %40 : vector<16x128xf32>
    %42 = arith.addf %30, %41 : vector<16x128xf32>
    %43 = vector.extract_strided_slice %1 {offsets = [0, 7], sizes = [16, 1], strides = [1, 1]} : vector<16x8xf32> to vector<16x1xf32>
    %44 = vector.extract_strided_slice %0 {offsets = [7, 0], sizes = [1, 128], strides = [1, 1]} : vector<8x128xf32> to vector<1x128xf32>
    %45 = vector.broadcast %43 : vector<16x1xf32> to vector<16x128xf32>
    %46 = vector.broadcast %44 : vector<1x128xf32> to vector<16x128xf32>
    %47 = arith.mulf %45, %46 : vector<16x128xf32>
    %48 = arith.addf %36, %47 : vector<16x128xf32>
    %49 = vector.broadcast %2 : vector<16x1xf32> to vector<16x128xf32>
    %50 = arith.addf %48, %49 : vector<16x128xf32>
    %51 = arith.addf %42, %50 : vector<16x128xf32>
    %52 = math.tanh %51 : vector<16x128xf32>
    %c0_5 = arith.constant 0 : index
    %c0_6 = arith.constant 0 : index
    %53 = vector.load %arg4[%c0_5, %c0_6] : memref<4x16xf32, #tpu.memory_space<vmem>>, vector<4x16xf32>
    %c0_7 = arith.constant 0 : index
    %c0_8 = arith.constant 0 : index
    %54 = vector.load %arg5[%c0_7, %c0_8] : memref<4x1xf32, #tpu.memory_space<vmem>>, vector<4x1xf32>
    %55 = vector.extract_strided_slice %53 {offsets = [0, 0], sizes = [4, 1], strides = [1, 1]} : vector<4x16xf32> to vector<4x1xf32>
    %56 = vector.extract_strided_slice %52 {offsets = [0, 0], sizes = [1, 128], strides = [1, 1]} : vector<16x128xf32> to vector<1x128xf32>
    %57 = vector.broadcast %55 : vector<4x1xf32> to vector<4x128xf32>
    %58 = vector.broadcast %56 : vector<1x128xf32> to vector<4x128xf32>
    %59 = arith.mulf %57, %58 : vector<4x128xf32>
    %60 = vector.extract_strided_slice %53 {offsets = [0, 1], sizes = [4, 1], strides = [1, 1]} : vector<4x16xf32> to vector<4x1xf32>
    %61 = vector.extract_strided_slice %52 {offsets = [1, 0], sizes = [1, 128], strides = [1, 1]} : vector<16x128xf32> to vector<1x128xf32>
    %62 = vector.broadcast %60 : vector<4x1xf32> to vector<4x128xf32>
    %63 = vector.broadcast %61 : vector<1x128xf32> to vector<4x128xf32>
    %64 = arith.mulf %62, %63 : vector<4x128xf32>
    %65 = vector.extract_strided_slice %53 {offsets = [0, 2], sizes = [4, 1], strides = [1, 1]} : vector<4x16xf32> to vector<4x1xf32>
    %66 = vector.extract_strided_slice %52 {offsets = [2, 0], sizes = [1, 128], strides = [1, 1]} : vector<16x128xf32> to vector<1x128xf32>
    %67 = vector.broadcast %65 : vector<4x1xf32> to vector<4x128xf32>
    %68 = vector.broadcast %66 : vector<1x128xf32> to vector<4x128xf32>
    %69 = arith.mulf %67, %68 : vector<4x128xf32>
    %70 = arith.addf %59, %69 : vector<4x128xf32>
    %71 = vector.extract_strided_slice %53 {offsets = [0, 3], sizes = [4, 1], strides = [1, 1]} : vector<4x16xf32> to vector<4x1xf32>
    %72 = vector.extract_strided_slice %52 {offsets = [3, 0], sizes = [1, 128], strides = [1, 1]} : vector<16x128xf32> to vector<1x128xf32>
    %73 = vector.broadcast %71 : vector<4x1xf32> to vector<4x128xf32>
    %74 = vector.broadcast %72 : vector<1x128xf32> to vector<4x128xf32>
    %75 = arith.mulf %73, %74 : vector<4x128xf32>
    %76 = arith.addf %64, %75 : vector<4x128xf32>
    %77 = vector.extract_strided_slice %53 {offsets = [0, 4], sizes = [4, 1], strides = [1, 1]} : vector<4x16xf32> to vector<4x1xf32>
    %78 = vector.extract_strided_slice %52 {offsets = [4, 0], sizes = [1, 128], strides = [1, 1]} : vector<16x128xf32> to vector<1x128xf32>
    %79 = vector.broadcast %77 : vector<4x1xf32> to vector<4x128xf32>
    %80 = vector.broadcast %78 : vector<1x128xf32> to vector<4x128xf32>
    %81 = arith.mulf %79, %80 : vector<4x128xf32>
    %82 = arith.addf %70, %81 : vector<4x128xf32>
    %83 = vector.extract_strided_slice %53 {offsets = [0, 5], sizes = [4, 1], strides = [1, 1]} : vector<4x16xf32> to vector<4x1xf32>
    %84 = vector.extract_strided_slice %52 {offsets = [5, 0], sizes = [1, 128], strides = [1, 1]} : vector<16x128xf32> to vector<1x128xf32>
    %85 = vector.broadcast %83 : vector<4x1xf32> to vector<4x128xf32>
    %86 = vector.broadcast %84 : vector<1x128xf32> to vector<4x128xf32>
    %87 = arith.mulf %85, %86 : vector<4x128xf32>
    %88 = arith.addf %76, %87 : vector<4x128xf32>
    %89 = vector.extract_strided_slice %53 {offsets = [0, 6], sizes = [4, 1], strides = [1, 1]} : vector<4x16xf32> to vector<4x1xf32>
    %90 = vector.extract_strided_slice %52 {offsets = [6, 0], sizes = [1, 128], strides = [1, 1]} : vector<16x128xf32> to vector<1x128xf32>
    %91 = vector.broadcast %89 : vector<4x1xf32> to vector<4x128xf32>
    %92 = vector.broadcast %90 : vector<1x128xf32> to vector<4x128xf32>
    %93 = arith.mulf %91, %92 : vector<4x128xf32>
    %94 = arith.addf %82, %93 : vector<4x128xf32>
    %95 = vector.extract_strided_slice %53 {offsets = [0, 7], sizes = [4, 1], strides = [1, 1]} : vector<4x16xf32> to vector<4x1xf32>
    %96 = vector.extract_strided_slice %52 {offsets = [7, 0], sizes = [1, 128], strides = [1, 1]} : vector<16x128xf32> to vector<1x128xf32>
    %97 = vector.broadcast %95 : vector<4x1xf32> to vector<4x128xf32>
    %98 = vector.broadcast %96 : vector<1x128xf32> to vector<4x128xf32>
    %99 = arith.mulf %97, %98 : vector<4x128xf32>
    %100 = arith.addf %88, %99 : vector<4x128xf32>
    %101 = vector.extract_strided_slice %53 {offsets = [0, 8], sizes = [4, 1], strides = [1, 1]} : vector<4x16xf32> to vector<4x1xf32>
    %102 = vector.extract_strided_slice %52 {offsets = [8, 0], sizes = [1, 128], strides = [1, 1]} : vector<16x128xf32> to vector<1x128xf32>
    %103 = vector.broadcast %101 : vector<4x1xf32> to vector<4x128xf32>
    %104 = vector.broadcast %102 : vector<1x128xf32> to vector<4x128xf32>
    %105 = arith.mulf %103, %104 : vector<4x128xf32>
    %106 = arith.addf %94, %105 : vector<4x128xf32>
    %107 = vector.extract_strided_slice %53 {offsets = [0, 9], sizes = [4, 1], strides = [1, 1]} : vector<4x16xf32> to vector<4x1xf32>
    %108 = vector.extract_strided_slice %52 {offsets = [9, 0], sizes = [1, 128], strides = [1, 1]} : vector<16x128xf32> to vector<1x128xf32>
    %109 = vector.broadcast %107 : vector<4x1xf32> to vector<4x128xf32>
    %110 = vector.broadcast %108 : vector<1x128xf32> to vector<4x128xf32>
    %111 = arith.mulf %109, %110 : vector<4x128xf32>
    %112 = arith.addf %100, %111 : vector<4x128xf32>
    %113 = vector.extract_strided_slice %53 {offsets = [0, 10], sizes = [4, 1], strides = [1, 1]} : vector<4x16xf32> to vector<4x1xf32>
    %114 = vector.extract_strided_slice %52 {offsets = [10, 0], sizes = [1, 128], strides = [1, 1]} : vector<16x128xf32> to vector<1x128xf32>
    %115 = vector.broadcast %113 : vector<4x1xf32> to vector<4x128xf32>
    %116 = vector.broadcast %114 : vector<1x128xf32> to vector<4x128xf32>
    %117 = arith.mulf %115, %116 : vector<4x128xf32>
    %118 = arith.addf %106, %117 : vector<4x128xf32>
    %119 = vector.extract_strided_slice %53 {offsets = [0, 11], sizes = [4, 1], strides = [1, 1]} : vector<4x16xf32> to vector<4x1xf32>
    %120 = vector.extract_strided_slice %52 {offsets = [11, 0], sizes = [1, 128], strides = [1, 1]} : vector<16x128xf32> to vector<1x128xf32>
    %121 = vector.broadcast %119 : vector<4x1xf32> to vector<4x128xf32>
    %122 = vector.broadcast %120 : vector<1x128xf32> to vector<4x128xf32>
    %123 = arith.mulf %121, %122 : vector<4x128xf32>
    %124 = arith.addf %112, %123 : vector<4x128xf32>
    %125 = vector.extract_strided_slice %53 {offsets = [0, 12], sizes = [4, 1], strides = [1, 1]} : vector<4x16xf32> to vector<4x1xf32>
    %126 = vector.extract_strided_slice %52 {offsets = [12, 0], sizes = [1, 128], strides = [1, 1]} : vector<16x128xf32> to vector<1x128xf32>
    %127 = vector.broadcast %125 : vector<4x1xf32> to vector<4x128xf32>
    %128 = vector.broadcast %126 : vector<1x128xf32> to vector<4x128xf32>
    %129 = arith.mulf %127, %128 : vector<4x128xf32>
    %130 = arith.addf %118, %129 : vector<4x128xf32>
    %131 = vector.extract_strided_slice %53 {offsets = [0, 13], sizes = [4, 1], strides = [1, 1]} : vector<4x16xf32> to vector<4x1xf32>
    %132 = vector.extract_strided_slice %52 {offsets = [13, 0], sizes = [1, 128], strides = [1, 1]} : vector<16x128xf32> to vector<1x128xf32>
    %133 = vector.broadcast %131 : vector<4x1xf32> to vector<4x128xf32>
    %134 = vector.broadcast %132 : vector<1x128xf32> to vector<4x128xf32>
    %135 = arith.mulf %133, %134 : vector<4x128xf32>
    %136 = arith.addf %124, %135 : vector<4x128xf32>
    %137 = vector.extract_strided_slice %53 {offsets = [0, 14], sizes = [4, 1], strides = [1, 1]} : vector<4x16xf32> to vector<4x1xf32>
    %138 = vector.extract_strided_slice %52 {offsets = [14, 0], sizes = [1, 128], strides = [1, 1]} : vector<16x128xf32> to vector<1x128xf32>
    %139 = vector.broadcast %137 : vector<4x1xf32> to vector<4x128xf32>
    %140 = vector.broadcast %138 : vector<1x128xf32> to vector<4x128xf32>
    %141 = arith.mulf %139, %140 : vector<4x128xf32>
    %142 = arith.addf %130, %141 : vector<4x128xf32>
    %143 = vector.extract_strided_slice %53 {offsets = [0, 15], sizes = [4, 1], strides = [1, 1]} : vector<4x16xf32> to vector<4x1xf32>
    %144 = vector.extract_strided_slice %52 {offsets = [15, 0], sizes = [1, 128], strides = [1, 1]} : vector<16x128xf32> to vector<1x128xf32>
    %145 = vector.broadcast %143 : vector<4x1xf32> to vector<4x128xf32>
    %146 = vector.broadcast %144 : vector<1x128xf32> to vector<4x128xf32>
    %147 = arith.mulf %145, %146 : vector<4x128xf32>
    %148 = arith.addf %136, %147 : vector<4x128xf32>
    %149 = vector.broadcast %54 : vector<4x1xf32> to vector<4x128xf32>
    %150 = arith.addf %148, %149 : vector<4x128xf32>
    %151 = arith.addf %142, %150 : vector<4x128xf32>
    %152 = math.tanh %151 : vector<4x128xf32>
    %cst = arith.constant 5.000000e-01 : f32
    %153 = vector.broadcast %cst : f32 to vector<4x128xf32>
    %154 = arith.mulf %153, %152 : vector<4x128xf32>
    %cst_9 = arith.constant 5.000000e-01 : f32
    %155 = vector.broadcast %cst_9 : f32 to vector<4x128xf32>
    %156 = arith.addf %154, %155 : vector<4x128xf32>
    %c0_10 = arith.constant 0 : index
    %c0_11 = arith.constant 0 : index
    %157 = vector.load %arg10[%c0_10, %c0_11] : memref<4x128xf32, #tpu.memory_space<vmem>>, vector<4x128xf32>
    tpu.vector_store %arg10[%c0_10, %c0_11], %156 {strides = array<i32>} : memref<4x128xf32, #tpu.memory_space<vmem>>, vector<4x128xf32>,
    %c0_12 = arith.constant 0 : index
    %c0_13 = arith.constant 0 : index
    %158 = vector.load %arg6[%c0_12, %c0_13] : memref<16x4xf32, #tpu.memory_space<vmem>>, vector<16x4xf32>
    %c0_14 = arith.constant 0 : index
    %c0_15 = arith.constant 0 : index
    %159 = vector.load %arg7[%c0_14, %c0_15] : memref<16x1xf32, #tpu.memory_space<vmem>>, vector<16x1xf32>
    %160 = vector.extract_strided_slice %158 {offsets = [0, 0], sizes = [16, 1], strides = [1, 1]} : vector<16x4xf32> to vector<16x1xf32>
    %161 = vector.extract_strided_slice %156 {offsets = [0, 0], sizes = [1, 128], strides = [1, 1]} : vector<4x128xf32> to vector<1x128xf32>
    %162 = vector.broadcast %160 : vector<16x1xf32> to vector<16x128xf32>
    %163 = vector.broadcast %161 : vector<1x128xf32> to vector<16x128xf32>
    %164 = arith.mulf %162, %163 : vector<16x128xf32>
    %165 = vector.extract_strided_slice %158 {offsets = [0, 1], sizes = [16, 1], strides = [1, 1]} : vector<16x4xf32> to vector<16x1xf32>
    %166 = vector.extract_strided_slice %156 {offsets = [1, 0], sizes = [1, 128], strides = [1, 1]} : vector<4x128xf32> to vector<1x128xf32>
    %167 = vector.broadcast %165 : vector<16x1xf32> to vector<16x128xf32>
    %168 = vector.broadcast %166 : vector<1x128xf32> to vector<16x128xf32>
    %169 = arith.mulf %167, %168 : vector<16x128xf32>
    %170 = vector.extract_strided_slice %158 {offsets = [0, 2], sizes = [16, 1], strides = [1, 1]} : vector<16x4xf32> to vector<16x1xf32>
    %171 = vector.extract_strided_slice %156 {offsets = [2, 0], sizes = [1, 128], strides = [1, 1]} : vector<4x128xf32> to vector<1x128xf32>
    %172 = vector.broadcast %170 : vector<16x1xf32> to vector<16x128xf32>
    %173 = vector.broadcast %171 : vector<1x128xf32> to vector<16x128xf32>
    %174 = arith.mulf %172, %173 : vector<16x128xf32>
    %175 = arith.addf %164, %174 : vector<16x128xf32>
    %176 = vector.extract_strided_slice %158 {offsets = [0, 3], sizes = [16, 1], strides = [1, 1]} : vector<16x4xf32> to vector<16x1xf32>
    %177 = vector.extract_strided_slice %156 {offsets = [3, 0], sizes = [1, 128], strides = [1, 1]} : vector<4x128xf32> to vector<1x128xf32>
    %178 = vector.broadcast %176 : vector<16x1xf32> to vector<16x128xf32>
    %179 = vector.broadcast %177 : vector<1x128xf32> to vector<16x128xf32>
    %180 = arith.mulf %178, %179 : vector<16x128xf32>
    %181 = arith.addf %169, %180 : vector<16x128xf32>
    %182 = vector.broadcast %159 : vector<16x1xf32> to vector<16x128xf32>
    %183 = arith.addf %181, %182 : vector<16x128xf32>
    %184 = arith.addf %175, %183 : vector<16x128xf32>
    %185 = math.tanh %184 : vector<16x128xf32>
    %c0_16 = arith.constant 0 : index
    %c0_17 = arith.constant 0 : index
    %186 = vector.load %arg8[%c0_16, %c0_17] : memref<8x16xf32, #tpu.memory_space<vmem>>, vector<8x16xf32>
    %c0_18 = arith.constant 0 : index
    %c0_19 = arith.constant 0 : index
    %187 = vector.load %arg9[%c0_18, %c0_19] : memref<8x1xf32, #tpu.memory_space<vmem>>, vector<8x1xf32>
    %188 = vector.extract_strided_slice %186 {offsets = [0, 0], sizes = [8, 1], strides = [1, 1]} : vector<8x16xf32> to vector<8x1xf32>
    %189 = vector.extract_strided_slice %185 {offsets = [0, 0], sizes = [1, 128], strides = [1, 1]} : vector<16x128xf32> to vector<1x128xf32>
    %190 = vector.broadcast %188 : vector<8x1xf32> to vector<8x128xf32>
    %191 = vector.broadcast %189 : vector<1x128xf32> to vector<8x128xf32>
    %192 = arith.mulf %190, %191 : vector<8x128xf32>
    %193 = vector.extract_strided_slice %186 {offsets = [0, 1], sizes = [8, 1], strides = [1, 1]} : vector<8x16xf32> to vector<8x1xf32>
    %194 = vector.extract_strided_slice %185 {offsets = [1, 0], sizes = [1, 128], strides = [1, 1]} : vector<16x128xf32> to vector<1x128xf32>
    %195 = vector.broadcast %193 : vector<8x1xf32> to vector<8x128xf32>
    %196 = vector.broadcast %194 : vector<1x128xf32> to vector<8x128xf32>
    %197 = arith.mulf %195, %196 : vector<8x128xf32>
    %198 = vector.extract_strided_slice %186 {offsets = [0, 2], sizes = [8, 1], strides = [1, 1]} : vector<8x16xf32> to vector<8x1xf32>
    %199 = vector.extract_strided_slice %185 {offsets = [2, 0], sizes = [1, 128], strides = [1, 1]} : vector<16x128xf32> to vector<1x128xf32>
    %200 = vector.broadcast %198 : vector<8x1xf32> to vector<8x128xf32>
    %201 = vector.broadcast %199 : vector<1x128xf32> to vector<8x128xf32>
    %202 = arith.mulf %200, %201 : vector<8x128xf32>
    %203 = arith.addf %192, %202 : vector<8x128xf32>
    %204 = vector.extract_strided_slice %186 {offsets = [0, 3], sizes = [8, 1], strides = [1, 1]} : vector<8x16xf32> to vector<8x1xf32>
    %205 = vector.extract_strided_slice %185 {offsets = [3, 0], sizes = [1, 128], strides = [1, 1]} : vector<16x128xf32> to vector<1x128xf32>
    %206 = vector.broadcast %204 : vector<8x1xf32> to vector<8x128xf32>
    %207 = vector.broadcast %205 : vector<1x128xf32> to vector<8x128xf32>
    %208 = arith.mulf %206, %207 : vector<8x128xf32>
    %209 = arith.addf %197, %208 : vector<8x128xf32>
    %210 = vector.extract_strided_slice %186 {offsets = [0, 4], sizes = [8, 1], strides = [1, 1]} : vector<8x16xf32> to vector<8x1xf32>
    %211 = vector.extract_strided_slice %185 {offsets = [4, 0], sizes = [1, 128], strides = [1, 1]} : vector<16x128xf32> to vector<1x128xf32>
    %212 = vector.broadcast %210 : vector<8x1xf32> to vector<8x128xf32>
    %213 = vector.broadcast %211 : vector<1x128xf32> to vector<8x128xf32>
    %214 = arith.mulf %212, %213 : vector<8x128xf32>
    %215 = arith.addf %203, %214 : vector<8x128xf32>
    %216 = vector.extract_strided_slice %186 {offsets = [0, 5], sizes = [8, 1], strides = [1, 1]} : vector<8x16xf32> to vector<8x1xf32>
    %217 = vector.extract_strided_slice %185 {offsets = [5, 0], sizes = [1, 128], strides = [1, 1]} : vector<16x128xf32> to vector<1x128xf32>
    %218 = vector.broadcast %216 : vector<8x1xf32> to vector<8x128xf32>
    %219 = vector.broadcast %217 : vector<1x128xf32> to vector<8x128xf32>
    %220 = arith.mulf %218, %219 : vector<8x128xf32>
    %221 = arith.addf %209, %220 : vector<8x128xf32>
    %222 = vector.extract_strided_slice %186 {offsets = [0, 6], sizes = [8, 1], strides = [1, 1]} : vector<8x16xf32> to vector<8x1xf32>
    %223 = vector.extract_strided_slice %185 {offsets = [6, 0], sizes = [1, 128], strides = [1, 1]} : vector<16x128xf32> to vector<1x128xf32>
    %224 = vector.broadcast %222 : vector<8x1xf32> to vector<8x128xf32>
    %225 = vector.broadcast %223 : vector<1x128xf32> to vector<8x128xf32>
    %226 = arith.mulf %224, %225 : vector<8x128xf32>
    %227 = arith.addf %215, %226 : vector<8x128xf32>
    %228 = vector.extract_strided_slice %186 {offsets = [0, 7], sizes = [8, 1], strides = [1, 1]} : vector<8x16xf32> to vector<8x1xf32>
    %229 = vector.extract_strided_slice %185 {offsets = [7, 0], sizes = [1, 128], strides = [1, 1]} : vector<16x128xf32> to vector<1x128xf32>
    %230 = vector.broadcast %228 : vector<8x1xf32> to vector<8x128xf32>
    %231 = vector.broadcast %229 : vector<1x128xf32> to vector<8x128xf32>
    %232 = arith.mulf %230, %231 : vector<8x128xf32>
    %233 = arith.addf %221, %232 : vector<8x128xf32>
    %234 = vector.extract_strided_slice %186 {offsets = [0, 8], sizes = [8, 1], strides = [1, 1]} : vector<8x16xf32> to vector<8x1xf32>
    %235 = vector.extract_strided_slice %185 {offsets = [8, 0], sizes = [1, 128], strides = [1, 1]} : vector<16x128xf32> to vector<1x128xf32>
    %236 = vector.broadcast %234 : vector<8x1xf32> to vector<8x128xf32>
    %237 = vector.broadcast %235 : vector<1x128xf32> to vector<8x128xf32>
    %238 = arith.mulf %236, %237 : vector<8x128xf32>
    %239 = arith.addf %227, %238 : vector<8x128xf32>
    %240 = vector.extract_strided_slice %186 {offsets = [0, 9], sizes = [8, 1], strides = [1, 1]} : vector<8x16xf32> to vector<8x1xf32>
    %241 = vector.extract_strided_slice %185 {offsets = [9, 0], sizes = [1, 128], strides = [1, 1]} : vector<16x128xf32> to vector<1x128xf32>
    %242 = vector.broadcast %240 : vector<8x1xf32> to vector<8x128xf32>
    %243 = vector.broadcast %241 : vector<1x128xf32> to vector<8x128xf32>
    %244 = arith.mulf %242, %243 : vector<8x128xf32>
    %245 = arith.addf %233, %244 : vector<8x128xf32>
    %246 = vector.extract_strided_slice %186 {offsets = [0, 10], sizes = [8, 1], strides = [1, 1]} : vector<8x16xf32> to vector<8x1xf32>
    %247 = vector.extract_strided_slice %185 {offsets = [10, 0], sizes = [1, 128], strides = [1, 1]} : vector<16x128xf32> to vector<1x128xf32>
    %248 = vector.broadcast %246 : vector<8x1xf32> to vector<8x128xf32>
    %249 = vector.broadcast %247 : vector<1x128xf32> to vector<8x128xf32>
    %250 = arith.mulf %248, %249 : vector<8x128xf32>
    %251 = arith.addf %239, %250 : vector<8x128xf32>
    %252 = vector.extract_strided_slice %186 {offsets = [0, 11], sizes = [8, 1], strides = [1, 1]} : vector<8x16xf32> to vector<8x1xf32>
    %253 = vector.extract_strided_slice %185 {offsets = [11, 0], sizes = [1, 128], strides = [1, 1]} : vector<16x128xf32> to vector<1x128xf32>
    %254 = vector.broadcast %252 : vector<8x1xf32> to vector<8x128xf32>
    %255 = vector.broadcast %253 : vector<1x128xf32> to vector<8x128xf32>
    %256 = arith.mulf %254, %255 : vector<8x128xf32>
    %257 = arith.addf %245, %256 : vector<8x128xf32>
    %258 = vector.extract_strided_slice %186 {offsets = [0, 12], sizes = [8, 1], strides = [1, 1]} : vector<8x16xf32> to vector<8x1xf32>
    %259 = vector.extract_strided_slice %185 {offsets = [12, 0], sizes = [1, 128], strides = [1, 1]} : vector<16x128xf32> to vector<1x128xf32>
    %260 = vector.broadcast %258 : vector<8x1xf32> to vector<8x128xf32>
    %261 = vector.broadcast %259 : vector<1x128xf32> to vector<8x128xf32>
    %262 = arith.mulf %260, %261 : vector<8x128xf32>
    %263 = arith.addf %251, %262 : vector<8x128xf32>
    %264 = vector.extract_strided_slice %186 {offsets = [0, 13], sizes = [8, 1], strides = [1, 1]} : vector<8x16xf32> to vector<8x1xf32>
    %265 = vector.extract_strided_slice %185 {offsets = [13, 0], sizes = [1, 128], strides = [1, 1]} : vector<16x128xf32> to vector<1x128xf32>
    %266 = vector.broadcast %264 : vector<8x1xf32> to vector<8x128xf32>
    %267 = vector.broadcast %265 : vector<1x128xf32> to vector<8x128xf32>
    %268 = arith.mulf %266, %267 : vector<8x128xf32>
    %269 = arith.addf %257, %268 : vector<8x128xf32>
    %270 = vector.extract_strided_slice %186 {offsets = [0, 14], sizes = [8, 1], strides = [1, 1]} : vector<8x16xf32> to vector<8x1xf32>
    %271 = vector.extract_strided_slice %185 {offsets = [14, 0], sizes = [1, 128], strides = [1, 1]} : vector<16x128xf32> to vector<1x128xf32>
    %272 = vector.broadcast %270 : vector<8x1xf32> to vector<8x128xf32>
    %273 = vector.broadcast %271 : vector<1x128xf32> to vector<8x128xf32>
    %274 = arith.mulf %272, %273 : vector<8x128xf32>
    %275 = arith.addf %263, %274 : vector<8x128xf32>
    %276 = vector.extract_strided_slice %186 {offsets = [0, 15], sizes = [8, 1], strides = [1, 1]} : vector<8x16xf32> to vector<8x1xf32>
    %277 = vector.extract_strided_slice %185 {offsets = [15, 0], sizes = [1, 128], strides = [1, 1]} : vector<16x128xf32> to vector<1x128xf32>
    %278 = vector.broadcast %276 : vector<8x1xf32> to vector<8x128xf32>
    %279 = vector.broadcast %277 : vector<1x128xf32> to vector<8x128xf32>
    %280 = arith.mulf %278, %279 : vector<8x128xf32>
    %281 = arith.addf %269, %280 : vector<8x128xf32>
    %282 = vector.broadcast %187 : vector<8x1xf32> to vector<8x128xf32>
    %283 = arith.addf %281, %282 : vector<8x128xf32>
    %284 = arith.addf %275, %283 : vector<8x128xf32>
    %285 = math.tanh %284 : vector<8x128xf32>
    %cst_20 = arith.constant 5.000000e-01 : f32
    %286 = vector.broadcast %cst_20 : f32 to vector<8x128xf32>
    %287 = arith.mulf %286, %285 : vector<8x128xf32>
    %cst_21 = arith.constant 5.000000e-01 : f32
    %288 = vector.broadcast %cst_21 : f32 to vector<8x128xf32>
    %289 = arith.addf %287, %288 : vector<8x128xf32>
    %c0_22 = arith.constant 0 : index
    %c0_23 = arith.constant 0 : index
    %290 = vector.load %arg11[%c0_22, %c0_23] : memref<8x128xf32, #tpu.memory_space<vmem>>, vector<8x128xf32>
    tpu.vector_store %arg11[%c0_22, %c0_23], %289 {strides = array<i32>} : memref<8x128xf32, #tpu.memory_space<vmem>>, vector<8x128xf32>,
    return
  }
  func.func @transform_0(%arg0: i32) -> (i32, i32) {
    %c0_i32 = arith.constant 0 : i32
    %c0_i32_0 = arith.constant 0 : i32
    return %c0_i32, %arg0 : i32, i32
  }
  func.func @transform_1(%arg0: i32) -> (i32, i32) {
    %c0_i32 = arith.constant 0 : i32
    %c0_i32_0 = arith.constant 0 : i32
    %c0_i32_1 = arith.constant 0 : i32
    return %c0_i32, %c0_i32_0 : i32, i32
  }
  func.func @transform_2(%arg0: i32) -> (i32, i32) {
    %c0_i32 = arith.constant 0 : i32
    %c0_i32_0 = arith.constant 0 : i32
    %c0_i32_1 = arith.constant 0 : i32
    return %c0_i32, %c0_i32_0 : i32, i32
  }
  func.func @transform_3(%arg0: i32) -> (i32, i32) {
    %c0_i32 = arith.constant 0 : i32
    %c0_i32_0 = arith.constant 0 : i32
    %c0_i32_1 = arith.constant 0 : i32
    return %c0_i32, %c0_i32_0 : i32, i32
  }
  func.func @transform_4(%arg0: i32) -> (i32, i32) {
    %c0_i32 = arith.constant 0 : i32
    %c0_i32_0 = arith.constant 0 : i32
    %c0_i32_1 = arith.constant 0 : i32
    return %c0_i32, %c0_i32_0 : i32, i32
  }
  func.func @transform_5(%arg0: i32) -> (i32, i32) {
    %c0_i32 = arith.constant 0 : i32
    %c0_i32_0 = arith.constant 0 : i32
    %c0_i32_1 = arith.constant 0 : i32
    return %c0_i32, %c0_i32_0 : i32, i32
  }
  func.func @transform_6(%arg0: i32) -> (i32, i32) {
    %c0_i32 = arith.constant 0 : i32
    %c0_i32_0 = arith.constant 0 : i32
    %c0_i32_1 = arith.constant 0 : i32
    return %c0_i32, %c0_i32_0 : i32, i32
  }
  func.func @transform_7(%arg0: i32) -> (i32, i32) {
    %c0_i32 = arith.constant 0 : i32
    %c0_i32_0 = arith.constant 0 : i32
    %c0_i32_1 = arith.constant 0 : i32
    return %c0_i32, %c0_i32_0 : i32, i32
  }
  func.func @transform_8(%arg0: i32) -> (i32, i32) {
    %c0_i32 = arith.constant 0 : i32
    %c0_i32_0 = arith.constant 0 : i32
    %c0_i32_1 = arith.constant 0 : i32
    return %c0_i32, %c0_i32_0 : i32, i32
  }
  func.func @transform_9(%arg0: i32) -> (i32, i32) {
    %c0_i32 = arith.constant 0 : i32
    %c0_i32_0 = arith.constant 0 : i32
    return %c0_i32, %arg0 : i32, i32
  }
  func.func @transform_10(%arg0: i32) -> (i32, i32) {
    %c0_i32 = arith.constant 0 : i32
    %c0_i32_0 = arith.constant 0 : i32
    return %c0_i32, %arg0 : i32, i32
  }
}

</mosaic_0001>

<bundles_post_ra>
// kernel: autoencoder_forward_t.1
= control target key start
LH: loop header
LB: loop body
LE: loop exit
PB: predicated region body
PF: predicated region fallthrough
CT: control target
= control target key end

     0   :  { %16 = vsyncpa [#allocation3], 0  ;;  %v767_v1 = vmov 2   ;;  %v768_v2 = vmov 1   ;;  %s1053_s0 = inlined_call_operand.vmem [shape: f32[8,128], index: 0, kind: input, shape index: {}]   ;;  %s1054_s1 = inlined_call_operand.vmem [shape: f32[16,8], index: 1, kind: input, shape index: {}]   ;;  %s1055_s2 = inlined_call_operand.vmem [shape: f32[16,1], index: 2, kind: input, shape index: {}]   ;;  %s1056_s3 = inlined_call_operand.vmem [shape: f32[4,16], index: 3, kind: input, shape index: {}]   ;;  %s1057_s4 = inlined_call_operand.vmem [shape: f32[4,1], index: 4, kind: input, shape index: {}]   ;;  %s1058_s5 = inlined_call_operand.vmem [shape: f32[16,4], index: 5, kind: input, shape index: {}]   ;;  %s1059_s6 = inlined_call_operand.vmem [shape: f32[16,1], index: 6, kind: input, shape index: {}]   ;;  %s1060_s7 = inlined_call_operand.vmem [shape: f32[8,16], index: 7, kind: input, shape index: {}]   ;;  %s1061_s8 = inlined_call_operand.vmem [shape: f32[8,1], index: 8, kind: input, shape index: {}]   ;;  %s1062_s9 = inlined_call_operand.hbm [shape: f32[4,128], index: 9, kind: output, shape index: {0}]   ;;  %s1063_s10 = inlined_call_operand.hbm [shape: f32[8,128], index: 10, kind: output, shape index: {1}]  }
   0x1   :  { %v37_v0 = vld [vmem:[%s1054_s1] sm:$0xff]  ;;  %656 = vset.pattern.permute.xlu0 %v767_v1  ;;  %655 = vset.pattern.permute.xlu1 %v768_v2  ;;  %v38_v3 = vld [vmem:[%s1054_s1 + $0x8] sm:$0xff] }
   0x2   :  { %72 = vperm.xlu0 %656, %v37_v0   ;;  %58 = vperm.xlu1 %655, %v37_v0  }
   0x3   :  { %17 = vsyncpa [#allocation5], 0  ;;  %v769_v4 = vmov 3   ;;  %v770_v5 = vmov 5   ;;  %v771_v6 = vmov 0   ;;  %v772_v7 = vmov 4  }
   0x4   :  { %v39_v8 = vld [vmem:[%s1055_s2] sm:$0xff]  ;;  %v773_v10 = vmov 6   ;;  %v774_v11 = vmov 7   ;;  %v40_v12 = vld [vmem:[%s1055_s2 + $0x8] sm:$0xff]  ;;  %v775_v13 = vmov 11   ;;  %v776_v14 = vmov 12  }
   0x5   :  { %v860_v9 = vld [vmem:[%s1056_s3] sm:$0xf]  ;;  %v356_v16 = vld [vmem:[%s1058_s5 + $0x8] sm:$0xff]  ;;  %v777_v20 = vmov 9   ;;  %v778_v22 = vmov 8   ;;  %v779_v23 = vmov 10   ;;  %v51_v38 = vlaneseq }
   0x6   :  { %659 = vset.pattern.permute.xlu0 %v769_v4  ;;  %62 = vperm.xlu1 %655, %v38_v3   ;;  %v184_v15 = vld [vmem:[%s1057_s4] sm:$0xf]  ;;  %v358_v19 = vld [vmem:[%s1059_s6 + $0x8] sm:$0xff]  ;;  %v780_v24 = vmov 13   ;;  %v781_v25 = vmov 15   ;;  %v782_v26 = vmov 14  }
   0x7   :  { %92 = vperm.xlu0 %659, %v38_v3   ;;  %v355_v17 = vld [vmem:[%s1058_s5] sm:$0xff]  ;;  %v52_v40 = vshrl.u32 %v51_v38, 7 }
   0x8   :  { %v357_v18 = vld [vmem:[%s1059_s6] sm:$0xff] }
   0x9   :  { %v907_v21 = vld [vmem:[%s1060_s7] sm:$0xff]  ;;  %v953_v42 = vsub.s32 1, %v52_v40  ;;  %v955_v43 = vsub.s32 3, %v52_v40  ;;  %v961_v47 = vsub.s32 5, %v52_v40  ;;  %v966_v50 = vsub.s32 0, %v52_v40 }
   0xa   :  { %657 = vset.pattern.permute.xlu1 %v767_v1  ;;  %v438_v27 = vld [vmem:[%s1061_s8] sm:$0xff]  ;;  %v968_v51 = vsub.s32 7, %v52_v40  ;;  %v970_v54 = vsub.s32 2, %v52_v40  ;;  %v976_v59 = vsub.s32 4, %v52_v40 }
   0xb   :  { %661 = vset.pattern.permute.xlu0 %v770_v5  ;;  %76 = vperm.xlu1 %657, %v38_v3   ;;  %v36_v44 = vld [vmem:[%s1053_s0] sm:$0xff]  ;;  %s783_s0 = smov [#allocation2]  }
   0xc   :  { %120 = vperm.xlu0 %661, %v37_v0   ;;  %v68_v48 = vrot.slane %v36_v44, %v953_v42  ;;  %v98_v49 = vrot.slane %v36_v44, %v955_v43  ;;  %v130_v55 = vrot.slane %v36_v44, %v961_v47  ;;  %v54_v58 = vrot.slane %v36_v44, %v966_v50  ;;  %s615_s11 = sshll.u32 %s783_s0, 4  ;;  %s616_s11 = int_to_ptr.vmem [resolvable:$true] %s615_s11 }
   0xd   :  { %v162_v60 = vrot.slane %v36_v44, %v968_v51  ;;  %v82_v61 = vrot.slane %v36_v44, %v970_v54  ;;  %s719_s12 = scalar_lea.vmem %s616_s11, 64  ;;  %p724_p1 = scmp.lt.s32.totalorder %s616_s11, %s616_s11 }
   0xe   :  { %p720_p0 = scmp.ne.s32.totalorder %s616_s11, %s719_s12  ;;  %p725_p2 = scmp.lt.s32.totalorder %s719_s12, %s719_s12 }
   0xf   :  { %658 = vset.pattern.permute.xlu1 %v769_v4 }
  0x10   :  { %662 = vset.pattern.permute.xlu0 %v771_v6  ;;  %88 = vperm.xlu1 %658, %v37_v0   ;;  %p726_p3 = por %p725_p2, %p724_p1 }
  0x11   :  { %43 = vperm.xlu0 %662, %v37_v0  }
  0x12   :  { %p727_p4 = pnand %p726_p3, %p720_p0 }
  0x14   :  { %660 = vset.pattern.permute.xlu1 %v772_v7 }
  0x15   :  { %48 = vperm.xlu0 %662, %v38_v3   ;;  %104 = vperm.xlu1 %660, %v37_v0  }
  0x19   :  { %169 = vperm.xlu0 %662, %v39_v8   ;;  %108 = vperm.xlu1 %660, %v38_v3  }
  0x1d   :  { %667 = vset.pattern.permute.xlu0 %v768_v2  ;;  %663 = vset.pattern.permute.xlu1 %v770_v5 }
  0x1e   :  { %196 = vperm.xlu0 %667, %v860_v9   ;;  %124 = vperm.xlu1 %663, %v38_v3  }
  0x22   :  { %670 = vset.pattern.permute.xlu0 %v772_v7  ;;  %664 = vset.pattern.permute.xlu1 %v773_v10 }
  0x23   :  { %225 = vperm.xlu0 %670, %v860_v9   ;;  %136 = vperm.xlu1 %664, %v37_v0  }
  0x27   :  { %671 = vset.pattern.permute.xlu0 %v773_v10  ;;  %665 = vset.pattern.permute.xlu1 %v774_v11 }
  0x28   :  { %140 = vperm.xlu0 %671, %v38_v3   ;;  %152 = vperm.xlu1 %665, %v37_v0   ;;  %v980_v0 = vsub.s32 6, %v52_v40 }
  0x2c   :  { %156 = vperm.xlu1 %665, %v38_v3   ;;  %245 = vperm.xlu0 %671, %v860_v9  }
  0x30   :  { %666 = vset.pattern.permute.xlu1 %v771_v6  ;;  %676 = vset.pattern.permute.xlu0 %v775_v13 }
  0x31   :  { %174 = vperm.xlu1 %666, %v40_v12   ;;  %295 = vperm.xlu0 %676, %v860_v9  }
  0x35   :  { %187 = vperm.xlu1 %666, %v860_v9   ;;  %679 = vset.pattern.permute.xlu0 %v776_v14 }
  0x36   :  { %305 = vperm.xlu0 %679, %v860_v9  }
  0x39   :  { %668 = vset.pattern.permute.xlu1 %v767_v1 }
  0x3a   :  { %205 = vperm.xlu1 %668, %v860_v9   ;;  %682 = vset.pattern.permute.xlu0 %v771_v6 }
  0x3b   :  { %346 = vperm.xlu0 %682, %v184_v15  }
  0x3e   :  { %669 = vset.pattern.permute.xlu1 %v769_v4 }
  0x3f   :  { %215 = vperm.xlu1 %669, %v860_v9   ;;  %687 = vset.pattern.permute.xlu0 %v769_v4 }
  0x40   :  { %410 = vperm.xlu0 %687, %v356_v16  }
  0x43   :  { %672 = vset.pattern.permute.xlu1 %v770_v5 }
  0x44   :  { %235 = vperm.xlu1 %672, %v860_v9   ;;  %688 = vset.pattern.permute.xlu0 %v771_v6 }
  0x45   :  { %361 = vperm.xlu0 %688, %v355_v17  }
  0x48   :  { %673 = vset.pattern.permute.xlu1 %v774_v11 }
  0x49   :  { %255 = vperm.xlu1 %673, %v860_v9   ;;  %423 = vperm.xlu0 %688, %v357_v18  }
  0x4d   :  { %674 = vset.pattern.permute.xlu1 %v777_v20  ;;  %428 = vperm.xlu0 %688, %v358_v19  }
  0x4e   :  { %275 = vperm.xlu1 %674, %v860_v9  }
  0x51   :  { %441 = vperm.xlu0 %688, %v907_v21  }
  0x52   :  { %675 = vset.pattern.permute.xlu1 %v778_v22 }
  0x53   :  { %265 = vperm.xlu1 %675, %v860_v9  }
  0x55   :  { %694 = vset.pattern.permute.xlu0 %v770_v5  ;;  %v114_v5 = vrot.slane %v36_v44, %v976_v59 }
  0x56   :  { %489 = vperm.xlu0 %694, %v907_v21  }
  0x57   :  { %677 = vset.pattern.permute.xlu1 %v779_v23 }
  0x58   :  { %285 = vperm.xlu1 %677, %v860_v9  }
  0x5a   :  { %697 = vset.pattern.permute.xlu0 %v773_v10 }
  0x5b   :  { %499 = vperm.xlu0 %697, %v907_v21  }
  0x5c   :  { %678 = vset.pattern.permute.xlu1 %v780_v24 }
  0x5d   :  { %315 = vperm.xlu1 %678, %v860_v9  }
  0x5f   :  { %700 = vset.pattern.permute.xlu0 %v775_v13 }
  0x60   :  { %549 = vperm.xlu0 %700, %v907_v21  }
  0x61   :  { %680 = vset.pattern.permute.xlu1 %v781_v25 }
  0x62   :  { %335 = vperm.xlu1 %680, %v860_v9  }
  0x64   :  { %703 = vset.pattern.permute.xlu0 %v776_v14 }
  0x65   :  { %559 = vperm.xlu0 %703, %v907_v21  }
  0x66   :  { %681 = vset.pattern.permute.xlu1 %v782_v26 }
  0x67   :  { %325 = vperm.xlu1 %681, %v860_v9  }
  0x69   :  { %706 = vset.pattern.permute.xlu0 %v771_v6 }
  0x6a   :  { %600 = vperm.xlu0 %706, %v438_v27  }
  0x6b   :  { %683 = vset.pattern.permute.xlu1 %v768_v2 }
  0x6c   :  { %376 = vperm.xlu1 %683, %v355_v17  }
  0x70   :  { %684 = vset.pattern.permute.xlu1 %v769_v4 }
  0x71   :  { %406 = vperm.xlu1 %684, %v355_v17  }
  0x75   :  { %685 = vset.pattern.permute.xlu1 %v767_v1 }
  0x76   :  { %390 = vperm.xlu1 %685, %v355_v17  }
  0x7a   :  { %686 = vset.pattern.permute.xlu1 %v768_v2 }
  0x7b   :  { %380 = vperm.xlu1 %686, %v356_v16  }
  0x7f   :  { %689 = vset.pattern.permute.xlu1 %v771_v6 }
  0x80   :  { %366 = vperm.xlu1 %689, %v356_v16  }
  0x81   :  { %v59_v28 = vpop.permute.xlu1 %58  ;;  %v73_v32 = vpop.permute.xlu0 %72 }
  0x82   :  { %v69_v57 = vmul.f32 %v68_v48, %v59_v28  ;;  %v83_v3 = vmul.f32 %v82_v61, %v73_v32 }
  0x84   :  { %690 = vset.pattern.permute.xlu1 %v767_v1 }
  0x85   :  { %394 = vperm.xlu1 %690, %v356_v16   ;;  %v935_v29 = vpop.permute.xlu1 %62 }
  0x86   :  { %v93_v34 = vpop.permute.xlu0 %92  ;;  %v70_v10 = vmul.f32 %v68_v48, %v935_v29 }
  0x89   :  { %691 = vset.pattern.permute.xlu1 %v768_v2 }
  0x8a   :  { %450 = vperm.xlu1 %691, %v907_v21   ;;  %v939_v30 = vpop.permute.xlu1 %76 }
  0x8b   :  { %v121_v36 = vpop.permute.xlu0 %120 }
  0x8c   :  { %v131_v62 = vmul.f32 %v130_v55, %v121_v36 }
  0x8e   :  { %692 = vset.pattern.permute.xlu1 %v769_v4 }
  0x8f   :  { %469 = vperm.xlu1 %692, %v907_v21   ;;  %v89_v31 = vpop.permute.xlu1 %88 }
  0x90   :  { %v44_v39 = vpop.permute.xlu0 %43  ;;  %v99_v56 = vmul.f32 %v98_v49, %v89_v31 }
  0x91   :  { %v55_v4 = vmul.f32 %v54_v58, %v44_v39 }
  0x92   :  { %v101_v63 = vadd.f32 %v99_v56, %v69_v57 }
  0x93   :  { %693 = vset.pattern.permute.xlu1 %v767_v1  ;;  %v85_v12 = vadd.f32 %v83_v3, %v55_v4 }
  0x94   :  { %459 = vperm.xlu1 %693, %v907_v21   ;;  %v105_v33 = vpop.permute.xlu1 %104  ;;  %v49_v45 = vpop.permute.xlu0 %48  ;;  %v133_v8 = vadd.f32 %v131_v62, %v101_v63 }
  0x95   :  { %v115_v13 = vmul.f32 %v114_v5, %v105_v33 }
  0x98   :  { %695 = vset.pattern.permute.xlu1 %v772_v7  ;;  %v946_v35 = vpop.permute.xlu1 %108  ;;  %v170_v52 = vpop.permute.xlu0 %169  ;;  %v146_v7 = vrot.slane %v36_v44, %v980_v0 }
  0x99   :  { %479 = vperm.xlu1 %695, %v907_v21   ;;  %v116_v31 = vmul.f32 %v114_v5, %v946_v35 }
  0x9d   :  { %696 = vset.pattern.permute.xlu1 %v774_v11  ;;  %v125_v37 = vpop.permute.xlu1 %124  ;;  %v197_v2 = vpop.permute.xlu0 %196  ;;  %v100_v11 = vmul.f32 %v98_v49, %v93_v34 }
  0x9e   :  { %509 = vperm.xlu1 %696, %v907_v21   ;;  %v132_v16 = vmul.f32 %v130_v55, %v125_v37 }
  0x9f   :  { %v102_v19 = vadd.f32 %v100_v11, %v70_v10 }
  0xa1   :  { %v134_v27 = vadd.f32 %v132_v16, %v102_v19 }
  0xa2   :  { %698 = vset.pattern.permute.xlu1 %v777_v20  ;;  %v137_v41 = vpop.permute.xlu1 %136  ;;  %v226_v15 = vpop.permute.xlu0 %225  ;;  %v117_v20 = vadd.f32 %v115_v13, %v85_v12 }
  0xa3   :  { %529 = vperm.xlu1 %698, %v907_v21   ;;  %v147_v17 = vmul.f32 %v146_v7, %v137_v41 }
  0xa5   :  { %v149_v28 = vadd.f32 %v147_v17, %v117_v20 }
  0xa7   :  { %699 = vset.pattern.permute.xlu1 %v778_v22  ;;  %v153_v46 = vpop.permute.xlu1 %152  ;;  %v141_v29 = vpop.permute.xlu0 %140 }
  0xa8   :  { %519 = vperm.xlu1 %699, %v907_v21   ;;  %v163_v6 = vmul.f32 %v162_v60, %v153_v46  ;;  %v148_v37 = vmul.f32 %v146_v7, %v141_v29 }
  0xaa   :  { %v165_v14 = vadd.f32 %v163_v6, %v133_v8 }
  0xab   :  { %v157_v53 = vpop.permute.xlu1 %156  ;;  %v246_v63 = vpop.permute.xlu0 %245 }
  0xac   :  { %701 = vset.pattern.permute.xlu1 %v779_v23  ;;  %v177_v22 = vadd.f32 %v170_v52, %v165_v14  ;;  %v164_v23 = vmul.f32 %v162_v60, %v157_v53 }
  0xad   :  { %539 = vperm.xlu1 %701, %v907_v21  }
  0xae   :  { %v179_v32 = vadd.f32 %v177_v22, %v149_v28  ;;  %v166_v33 = vadd.f32 %v164_v23, %v134_v27 }
  0xb0   :  { %v175_v1 = vpop.permute.xlu1 %174  ;;  %707 = vtanh.f32 %v179_v32  ;;  %v296_v16 = vpop.permute.xlu0 %295 }
  0xb1   :  { %702 = vset.pattern.permute.xlu1 %v780_v24  ;;  %v56_v24 = vmul.f32 %v54_v58, %v49_v45  ;;  %v178_v39 = vadd.f32 %v175_v1, %v166_v33 }
  0xb2   :  { %569 = vperm.xlu1 %702, %v907_v21  }
  0xb4   :  { %v188_v9 = vpop.permute.xlu1 %187 }
  0xb5   :  { %v306_v33 = vpop.permute.xlu0 %305 }
  0xb6   :  { %704 = vset.pattern.permute.xlu1 %v781_v25  ;;  %v84_v25 = vmul.f32 %v82_v61, %v939_v30 }
  0xb7   :  { %589 = vperm.xlu1 %704, %v907_v21  }
  0xb8   :  { %v86_v36 = vadd.f32 %v84_v25, %v56_v24 }
  0xb9   :  { %v206_v18 = vpop.permute.xlu1 %205 }
  0xba   :  { %v118_v38 = vadd.f32 %v116_v31, %v86_v36  ;;  %v708_v45 = vpop.eup %707 }
  0xbb   :  { %705 = vset.pattern.permute.xlu1 %v782_v26  ;;  %v193_v46 = vrot.slane %v708_v45, %v966_v50  ;;  %v211_v30 = vrot.slane %v708_v45, %v970_v54  ;;  %v202_v35 = vrot.slane %v708_v45, %v953_v42  ;;  %v221_v48 = vrot.slane %v708_v45, %v955_v43 }
  0xbc   :  { %579 = vperm.xlu1 %705, %v907_v21   ;;  %v150_v26 = vadd.f32 %v148_v37, %v118_v38  ;;  %v241_v56 = vrot.slane %v708_v45, %v961_v47  ;;  %v231_v58 = vrot.slane %v708_v45, %v976_v59  ;;  %v261_v62 = vrot.slane %v708_v45, %v968_v51 }
  0xbd   :  { %v194_v52 = vmul.f32 %v193_v46, %v188_v9  ;;  %v212_v53 = vmul.f32 %v211_v30, %v206_v18  ;;  %v203_v60 = vmul.f32 %v202_v35, %v197_v2  ;;  %v251_v7 = vrot.slane %v708_v45, %v980_v0 }
  0xbe   :  { %v216_v34 = vpop.permute.xlu1 %215  ;;  %v180_v41 = vadd.f32 %v178_v39, %v150_v26  ;;  %v232_v8 = vmul.f32 %v231_v58, %v226_v15  ;;  %v347_v26 = vpop.permute.xlu0 %346 }
  0xbf   :  { %v222_v55 = vmul.f32 %v221_v48, %v216_v34  ;;  %v213_v1 = vadd.f32 %v212_v53, %v194_v52  ;;  %v252_v14 = vmul.f32 %v251_v7, %v246_v63 }
  0xc0   :  { %709 = vtanh.f32 %v180_v41 }
  0xc1   :  { %v223_v3 = vadd.f32 %v222_v55, %v203_v60  ;;  %v233_v11 = vadd.f32 %v232_v8, %v213_v1 }
  0xc3   :  { %v236_v40 = vpop.permute.xlu1 %235  ;;  %v253_v24 = vadd.f32 %v252_v14, %v233_v11 }
  0xc4   :  { %v242_v61 = vmul.f32 %v241_v56, %v236_v40 }
  0xc6   :  { %v243_v9 = vadd.f32 %v242_v61, %v223_v3 }
  0xc8   :  { %v256_v44 = vpop.permute.xlu1 %255 }
  0xc9   :  { %v262_v4 = vmul.f32 %v261_v62, %v256_v44 }
  0xca   :  { %v710_v57 = vpop.eup %709 }
  0xcb   :  { %v281_v5 = vrot.slane %v710_v57, %v953_v42  ;;  %v301_v12 = vrot.slane %v710_v57, %v955_v43  ;;  %v263_v13 = vadd.f32 %v262_v4, %v243_v9  ;;  %v271_v2 = vrot.slane %v710_v57, %v966_v50 }
  0xcc   :  { %v291_v20 = vrot.slane %v710_v57, %v970_v54  ;;  %v321_v22 = vrot.slane %v710_v57, %v961_v47  ;;  %v341_v28 = vrot.slane %v710_v57, %v968_v51  ;;  %v311_v29 = vrot.slane %v710_v57, %v976_v59 }
  0xcd   :  { %v276_v21 = vpop.permute.xlu1 %275  ;;  %v302_v23 = vmul.f32 %v301_v12, %v296_v16  ;;  %v331_v40 = vrot.slane %v710_v57, %v980_v0 }
  0xce   :  { %v282_v10 = vmul.f32 %v281_v5, %v276_v21  ;;  %v312_v38 = vmul.f32 %v311_v29, %v306_v33 }
  0xd0   :  { %v283_v18 = vadd.f32 %v282_v10, %v263_v13 }
  0xd2   :  { %v266_v49 = vpop.permute.xlu1 %265  ;;  %v303_v31 = vadd.f32 %v302_v23, %v283_v18 }
  0xd3   :  { %v272_v19 = vmul.f32 %v271_v2, %v266_v49 }
  0xd5   :  { %v273_v25 = vadd.f32 %v272_v19, %v253_v24 }
  0xd7   :  { %v286_v6 = vpop.permute.xlu1 %285 }
  0xd8   :  { %v292_v15 = vmul.f32 %v291_v20, %v286_v6 }
  0xda   :  { %v293_v36 = vadd.f32 %v292_v15, %v273_v25 }
  0xdc   :  { %v316_v17 = vpop.permute.xlu1 %315  ;;  %v313_v44 = vadd.f32 %v312_v38, %v293_v36 }
  0xdd   :  { %v322_v27 = vmul.f32 %v321_v22, %v316_v17 }
  0xdf   :  { %v323_v37 = vadd.f32 %v322_v27, %v303_v31 }
  0xe1   :  { %v336_v32 = vpop.permute.xlu1 %335 }
  0xe2   :  { %v342_v34 = vmul.f32 %v341_v28, %v336_v32 }
  0xe4   :  { %v343_v39 = vadd.f32 %v342_v34, %v323_v37 }
  0xe6   :  { %v326_v41 = vpop.permute.xlu1 %325  ;;  %v349_v21 = vadd.f32 %v347_v26, %v343_v39 }
  0xe7   :  { %v332_v45 = vmul.f32 %v331_v40, %v326_v41 }
  0xe9   :  { %v333_v46 = vadd.f32 %v332_v45, %v313_v44 }
  0xeb   :  { %v350_v30 = vadd.f32 %v349_v21, %v333_v46  ;;  %v377_v35 = vpop.permute.xlu1 %376 }
  0xed   :  { %711 = vtanh.f32 %v350_v30 }
  0xf0   :  { %v407_v48 = vpop.permute.xlu1 %406 }
  0xf5   :  { %v391_v49 = vpop.permute.xlu1 %390 }
  0xf7   :  { %v712_v52 = vpop.eup %711 }
  0xf8   :  { %v352_v53 = vmul.f32 0.5, %v712_v52 }
  0xfa   :  { %v353_v55 = vadd.f32 0.5, %v352_v53  ;;  %v381_v56 = vpop.permute.xlu1 %380 }
  0xfc   :  { %354 = vst [vmem:[#allocation2] sm:$0xf] %v353_v55 }
  0xfd   :  { %730 = shalt.err (!%p727_p4)
}
  0xfe   :  { %s731_s15 = scalar_lea.hbm %s1062_s9, 64 }
  0xff   :  { %p732_p5 = scmp.ne.s32.totalorder %s1062_s9, %s731_s15  ;;  %p735_p6 = scmp.lt.u32.totalorder %s731_s15, %s1062_s9 }
 0x101   :  { %p737_p7 = pnand %p735_p6, %p732_p5 }
 0x103   :  { %740 = shalt.err (!%p737_p7)
}
 0x104   :  { %618 = dma.vmem_to_hbm [thread:$0]  %s616_s11, 64, %s1062_s9, [#allocation3]   ;;  %v367_v57 = vpop.permute.xlu1 %366  ;;  %v411_v58 = vpop.permute.xlu0 %410  ;;  %v386_v60 = vrot.slane %v353_v55, %v953_v42  ;;  %v416_v61 = vrot.slane %v353_v55, %v955_v43  ;;  %v400_v4 = vrot.slane %v353_v55, %v970_v54  ;;  %v372_v5 = vrot.slane %v353_v55, %v966_v50 }
 0x105   :  { %s784_s9 = smov [#allocation4]  }
 0x106   :  { %v387_v63 = vmul.f32 %v386_v60, %v377_v35  ;;  %v417_v1 = vmul.f32 %v416_v61, %v407_v48  ;;  %v401_v8 = vmul.f32 %v400_v4, %v391_v49  ;;  %v418_v2 = vmul.f32 %v416_v61, %v411_v58  ;;  %s625_s20 = sshll.u32 %s784_s9, 4  ;;  %s626_s20 = int_to_ptr.vmem [resolvable:$true] %s625_s20 }
 0x107   :  { %v388_v14 = vmul.f32 %v386_v60, %v381_v56  ;;  %v374_v19 = vmul.f32 %v372_v5, %v367_v57  ;;  %s741_s21 = scalar_lea.vmem %s626_s20, 128  ;;  %p746_p9 = scmp.lt.s32.totalorder %s626_s20, %s626_s20 }
 0x108   :  { %v395_v62 = vpop.permute.xlu1 %394  ;;  %v362_v3 = vpop.permute.xlu0 %361  ;;  %v419_v6 = vadd.f32 %v417_v1, %v387_v63  ;;  %p742_p8 = scmp.ne.s32.totalorder %s626_s20, %s741_s21  ;;  %p747_p10 = scmp.lt.s32.totalorder %s741_s21, %s741_s21 }
 0x109   :  { %v373_v9 = vmul.f32 %v372_v5, %v362_v3  ;;  %v402_v17 = vmul.f32 %v400_v4, %v395_v62  ;;  %v420_v20 = vadd.f32 %v418_v2, %v388_v14 }
 0x10a   :  { %p748_p11 = por %p747_p10, %p746_p9 }
 0x10b   :  { %v403_v13 = vadd.f32 %v401_v8, %v373_v9  ;;  %v404_v23 = vadd.f32 %v402_v17, %v374_v19 }
 0x10c   :  { %v451_v7 = vpop.permute.xlu1 %450  ;;  %v424_v10 = vpop.permute.xlu0 %423  ;;  %p749_p12 = pnand %p748_p11, %p742_p8 }
 0x10d   :  { %v431_v11 = vadd.f32 %v424_v10, %v419_v6 }
 0x10f   :  { %v433_v16 = vadd.f32 %v431_v11, %v403_v13 }
 0x110   :  { %v470_v12 = vpop.permute.xlu1 %469  ;;  %v429_v22 = vpop.permute.xlu0 %428 }
 0x111   :  { %713 = vtanh.f32 %v433_v16  ;;  %v432_v15 = vadd.f32 %v429_v22, %v420_v20 }
 0x113   :  { %v434_v27 = vadd.f32 %v432_v15, %v404_v23 }
 0x114   :  { %v460_v18 = vpop.permute.xlu1 %459  ;;  %v442_v25 = vpop.permute.xlu0 %441 }
 0x115   :  { %715 = vtanh.f32 %v434_v27 }
 0x118   :  { %v480_v24 = vpop.permute.xlu1 %479  ;;  %v490_v34 = vpop.permute.xlu0 %489 }
 0x11b   :  { %v714_v29 = vpop.eup %713 }
 0x11c   :  { %v456_v31 = vrot.slane %v714_v29, %v953_v42  ;;  %v475_v32 = vrot.slane %v714_v29, %v955_v43  ;;  %v447_v36 = vrot.slane %v714_v29, %v966_v50  ;;  %v465_v39 = vrot.slane %v714_v29, %v970_v54  ;;  %v500_v35 = vpop.permute.xlu0 %499 }
 0x11d   :  { %v510_v28 = vpop.permute.xlu1 %509  ;;  %v495_v26 = vrot.slane %v714_v29, %v961_v47  ;;  %v485_v44 = vrot.slane %v714_v29, %v976_v59  ;;  %v515_v30 = vrot.slane %v714_v29, %v968_v51  ;;  %v505_v56 = vrot.slane %v714_v29, %v980_v0 }
 0x11e   :  { %v457_v37 = vmul.f32 %v456_v31, %v451_v7  ;;  %v476_v38 = vmul.f32 %v475_v32, %v470_v12  ;;  %v448_v45 = vmul.f32 %v447_v36, %v442_v25  ;;  %v466_v46 = vmul.f32 %v465_v39, %v460_v18 }
 0x11f   :  { %v716_v41 = vpop.eup %715  ;;  %v496_v48 = vmul.f32 %v495_v26, %v490_v34  ;;  %v486_v49 = vmul.f32 %v485_v44, %v480_v24  ;;  %v516_v52 = vmul.f32 %v515_v30, %v510_v28  ;;  %v506_v3 = vmul.f32 %v505_v56, %v500_v35 }
 0x120   :  { %v477_v21 = vadd.f32 %v476_v38, %v457_v37  ;;  %v535_v53 = vrot.slane %v716_v41, %v953_v42  ;;  %v467_v57 = vadd.f32 %v466_v46, %v448_v45  ;;  %v555_v61 = vrot.slane %v716_v41, %v955_v43  ;;  %v550_v4 = vpop.permute.xlu0 %549 }
 0x121   :  { %v525_v1 = vrot.slane %v716_v41, %v966_v50  ;;  %v545_v8 = vrot.slane %v716_v41, %v970_v54  ;;  %v575_v42 = vrot.slane %v716_v41, %v961_v47  ;;  %v595_v13 = vrot.slane %v716_v41, %v968_v51 }
 0x122   :  { %v530_v33 = vpop.permute.xlu1 %529  ;;  %v497_v58 = vadd.f32 %v496_v48, %v477_v21  ;;  %v487_v62 = vadd.f32 %v486_v49, %v467_v57  ;;  %v556_v9 = vmul.f32 %v555_v61, %v550_v4  ;;  %v565_v43 = vrot.slane %v716_v41, %v976_v59 }
 0x123   :  { %v536_v60 = vmul.f32 %v535_v53, %v530_v33  ;;  %v585_v54 = vrot.slane %v716_v41, %v980_v0 }
 0x124   :  { %v517_v63 = vadd.f32 %v516_v52, %v497_v58  ;;  %v507_v10 = vadd.f32 %v506_v3, %v487_v62  ;;  %v560_v16 = vpop.permute.xlu0 %559 }
 0x125   :  { %v566_v20 = vmul.f32 %v565_v43, %v560_v16 }
 0x126   :  { %v537_v6 = vadd.f32 %v536_v60, %v517_v63 }
 0x127   :  { %v520_v40 = vpop.permute.xlu1 %519 }
 0x128   :  { %v526_v7 = vmul.f32 %v525_v1, %v520_v40  ;;  %v557_v14 = vadd.f32 %v556_v9, %v537_v6  ;;  %v601_v47 = vpop.permute.xlu0 %600 }
 0x12a   :  { %v527_v2 = vadd.f32 %v526_v7, %v507_v10 }
 0x12c   :  { %v540_v55 = vpop.permute.xlu1 %539 }
 0x12d   :  { %v546_v11 = vmul.f32 %v545_v8, %v540_v55 }
 0x12f   :  { %v547_v18 = vadd.f32 %v546_v11, %v527_v2 }
 0x131   :  { %v570_v5 = vpop.permute.xlu1 %569  ;;  %v567_v24 = vadd.f32 %v566_v20, %v547_v18 }
 0x132   :  { %v576_v12 = vmul.f32 %v575_v42, %v570_v5 }
 0x134   :  { %v577_v19 = vadd.f32 %v576_v12, %v557_v14 }
 0x136   :  { %v590_v50 = vpop.permute.xlu1 %589 }
 0x137   :  { %v596_v17 = vmul.f32 %v595_v13, %v590_v50 }
 0x139   :  { %v597_v22 = vadd.f32 %v596_v17, %v577_v19 }
 0x13b   :  { %v580_v23 = vpop.permute.xlu1 %579  ;;  %v603_v27 = vadd.f32 %v601_v47, %v597_v22 }
 0x13c   :  { %v586_v15 = vmul.f32 %v585_v54, %v580_v23 }
 0x13e   :  { %v587_v28 = vadd.f32 %v586_v15, %v567_v24 }
 0x140   :  { %v604_v51 = vadd.f32 %v603_v27, %v587_v28 }
 0x142   :  { %717 = vtanh.f32 %v604_v51 }
 0x14c   :  { %v718_v59 = vpop.eup %717 }
 0x14d   :  { %v606_v29 = vmul.f32 0.5, %v718_v59 }
 0x14f   :  { %v607_v25 = vadd.f32 0.5, %v606_v29 }
 0x151   :  { %608 = vst [vmem:[#allocation4] sm:$0xff] %v607_v25 }
 0x152   :  { %752 = shalt.err (!%p749_p12)
}
 0x153   :  { %s753_s23 = scalar_lea.hbm %s1063_s10, 128 }
 0x154   :  { %p754_p13 = scmp.ne.s32.totalorder %s1063_s10, %s753_s23  ;;  %p757_p0 = scmp.lt.u32.totalorder %s753_s23, %s1063_s10 }
 0x156   :  { %p759_p1 = pnand %p757_p0, %p754_p13 }
 0x158   :  { %762 = shalt.err (!%p759_p1)
}
 0x159   :  { %628 = dma.vmem_to_hbm [thread:$0]  %s626_s20, 128, %s1063_s10, [#allocation5]  }
 0x15a   :  { %763 = dma.done.wait [#allocation3], 64  }
 0x15b   :  { %764 = vsyncadd [#allocation3], 4294967232 }
 0x15c   :  { %765 = dma.done.wait [#allocation5], 128  }
 0x15d   :  { %766 = vsyncadd [#allocation5], 4294967168 }
 0x15e   :  { %635 = vsyncpa [#allocation3], 1 }
 0x15f   :  { %636 = vsyncpa [#allocation5], 1 }

</bundles_post_ra>
